<compile_context>
chip_gen: v6e
topology: v6e:2x2x1
jax: 0.10.0
libtpu: 0.0.40
codegen_flags: <defaults>
</compile_context>

<pallas_src>
import numpy as np
import jax
import jax.numpy as jnp
from jax.experimental import pallas as pl
from jax.experimental.pallas import tpu as pltpu

# ------------------------- shapes (small, module-consistent) -----------------
BATCH = 8
CHANNEL = 72                    # divisible by the module-default reduction
REDUCTION = 18                  # SELayer default
C_RED = CHANNEL // REDUCTION    # 4
H, W = 16, 16
HW = H * W                      # 256 -> lane-dense last dim (2 x 128)


# ------------------------- fused SE kernel -----------------------------------
def _se_kernel(x_ref, w1_ref, w2_ref, o_ref):
    # Transport dtype may be bf16; all arithmetic is done in f32.
    x = x_ref[...].astype(jnp.float32)               # (b_tile, C, HW) in VMEM

    # squeeze: AdaptiveAvgPool2d(1).  1/HW is pre-folded into w1 -> plain sum here.
    pooled = jnp.sum(x, axis=-1)                      # (b_tile, C)

    # excitation: Linear(C -> C/r, no bias) -> ReLU -> Linear(C/r -> C, no bias) -> sigmoid
    h = jnp.dot(pooled, w1_ref[...], preferred_element_type=jnp.float32)   # (b_tile, C_RED)
    h = jnp.maximum(h, 0.0)
    g = jnp.dot(h, w2_ref[...], preferred_element_type=jnp.float32)        # (b_tile, C)
    gate = 1.0 / (1.0 + jnp.exp(-g))                  # sigmoid (exp on EUP slot)

    # scale: broadcast the per-(b, c) gate over the spatial lanes
    o_ref[...] = (x * gate[:, :, None]).astype(o_ref.dtype)


def se_layer(x, w1, w2, *, b_tile=None, transport_dtype=None):
    """SELayer forward.

    x  : (B, C, H, W)
    w1 : (C, C_RED)  == fc[0].weight.T  (pre-transposed on host)
    w2 : (C_RED, C)  == fc[2].weight.T  (pre-transposed on host)
    transport_dtype : optional dtype (e.g. jnp.bfloat16) for HBM<->VMEM transport of
                      x / output; in-kernel math stays f32.
    """
    b, c, h, w = x.shape
    hw = h * w
    c_red = w1.shape[1]
    io_dtype = jnp.dtype(transport_dtype) if transport_dtype is not None else x.dtype

    # Tiling: exactly 2 grid steps when possible (v7x megacore) -> each step is a big,
    # overhead-amortizing DMA on single-TC v5e/v6e as well.
    if b_tile is None:
        b_tile = pl.cdiv(b, 2) if b >= 2 else 1
    n_steps = pl.cdiv(b, b_tile)
    b_pad = n_steps * b_tile

    x3 = x.reshape(b, c, hw).astype(io_dtype)         # lane-dense spatial axis
    if b_pad != b:                                     # robust to B % b_tile != 0
        x3 = jnp.pad(x3, ((0, b_pad - b), (0, 0), (0, 0)))

    # Fold the avg-pool's 1/HW into fc1's weight (exact for power-of-two HW).
    w1s = (w1 / float(hw)).astype(jnp.float32)
    w2f = w2.astype(jnp.float32)

    out = pl.pallas_call(
        _se_kernel,
        out_shape=jax.ShapeDtypeStruct((b_pad, c, hw), io_dtype),
        grid_spec=pltpu.PrefetchScalarGridSpec(
            num_scalar_prefetch=0,
            grid=(n_steps,),
            in_specs=[
                pl.BlockSpec((b_tile, c, hw), lambda i: (i, 0, 0)),   # batch tile of x
                pl.BlockSpec((c, c_red), lambda i: (0, 0)),           # fc1 weight (C, C/r)
                pl.BlockSpec((c_red, c), lambda i: (0, 0)),           # fc2 weight (C/r, C)
            ],
            out_specs=pl.BlockSpec((b_tile, c, hw), lambda i: (i, 0, 0)),
        ),
        compiler_params=pltpu.CompilerParams(dimension_semantics=("parallel",)),
        input_output_aliases={0: 0},                   # x3 is dead after this op
    )(x3, w1s, w2f)

    if b_pad != b:
        out = out[:b]
    return out.reshape(b, c, h, w)


# ------------------------- pure-JAX reference (PyTorch semantics) ------------
def se_reference(x, w1_pt, w2_pt):
    # w1_pt: (C_RED, C) == fc[0].weight ;  w2_pt: (C, C_RED) == fc[2].weight
    y = jnp.mean(x, axis=(2, 3))                       # avg_pool(1) + view(b, c)
    y = jnp.maximum(y @ w1_pt.T, 0.0)                  # Linear(C, C/r, bias=False) + ReLU
    y = jax.nn.sigmoid(y @ w2_pt.T)                    # Linear(C/r, C, bias=False) + Sigmoid
    return x * y[:, :, None, None]                     # view + expand_as + elementwise scale


# ------------------------- main -----------------------------------------------
if __name__ == "__main__":
    key = jax.random.PRNGKey(0)
    k_x, k_w1, k_w2 = jax.random.split(key, 3)

    x = jax.random.normal(k_x, (BATCH, CHANNEL, H, W), jnp.float32)
    # PyTorch-layout weights: fc[0].weight (C_RED, C), fc[2].weight (C, C_RED)
    w1_pt = 0.2 * jax.random.normal(k_w1, (C_RED, CHANNEL), jnp.float32)
    w2_pt = 0.2 * jax.random.normal(k_w2, (CHANNEL, C_RED), jnp.float32)

    ref = se_reference(x, w1_pt, w2_pt)

    # f32 transport: exact module semantics.
    fwd = jax.jit(se_layer)
    out = jax.block_until_ready(fwd(x, w1_pt.T, w2_pt.T))
    np.testing.assert_allclose(np.asarray(out), np.asarray(ref), rtol=1e-5, atol=1e-5)

    # bf16 transport: halves HBM bytes of this bandwidth-bound op; math stays f32.
    fwd_bf16 = jax.jit(
        lambda xx, a, b: se_layer(xx, a, b, transport_dtype=jnp.bfloat16))
    out_bf16 = jax.block_until_ready(fwd_bf16(x, w1_pt.T, w2_pt.T))
    np.testing.assert_allclose(np.asarray(out_bf16.astype(jnp.float32)),
                               np.asarray(ref), rtol=5e-2, atol=5e-2)

    print("KERNEL_OK")
</pallas_src>

<mosaic_0001>
module attributes {stable_mosaic.version = 11 : i64} {
  func.func @_se_kernel(%arg0: i32, %arg1: memref<4x72x256xf32, #tpu.memory_space<vmem>>, %arg2: memref<72x4xf32, #tpu.memory_space<vmem>>, %arg3: memref<4x72xf32, #tpu.memory_space<vmem>>, %arg4: memref<4x72x256xf32, #tpu.memory_space<vmem>>) attributes {dimension_semantics = [#tpu.dimension_semantics<parallel>], iteration_bounds = array<i64: 2>, scalar_prefetch = 0 : i64, scratch_operands = 0 : i64, tpu.core_type = #tpu.core_type<tc>, window_params = [{transform_indices = @transform_0, window_bounds = array<i64: 4, 72, 256>}, {pipeline_mode = #tpu.pipeline_mode<synchronous>, transform_indices = @transform_1, window_bounds = array<i64: 72, 4>}, {pipeline_mode = #tpu.pipeline_mode<synchronous>, transform_indices = @transform_2, window_bounds = array<i64: 4, 72>}, {transform_indices = @transform_3, window_bounds = array<i64: 4, 72, 256>}]} {
    %c0 = arith.constant 0 : index
    %c0_0 = arith.constant 0 : index
    %c0_1 = arith.constant 0 : index
    %0 = vector.load %arg1[%c0, %c0_0, %c0_1] : memref<4x72x256xf32, #tpu.memory_space<vmem>>, vector<4x72x256xf32>
    %cst = arith.constant dense<0.000000e+00> : vector<4x72xf32>
    %1 = vector.multi_reduction <add>, %0, %cst [2] : vector<4x72x256xf32> to vector<4x72xf32>
    %c0_2 = arith.constant 0 : index
    %c0_3 = arith.constant 0 : index
    %2 = vector.load %arg2[%c0_2, %c0_3] : memref<72x4xf32, #tpu.memory_space<vmem>>, vector<72x4xf32>
    %cst_4 = arith.constant dense<0.000000e+00> : vector<4x4xf32>
    %3 = tpu.matmul %1, %2, %cst_4 {dimension_numbers = #tpu.dot_dimension_numbers<[1], [0], [0], [1], [0, 0, 1, 1], [], []>} : vector<4x72xf32>, vector<72x4xf32>, vector<4x4xf32> -> vector<4x4xf32>
    %cst_5 = arith.constant 0.000000e+00 : f32
    %4 = vector.broadcast %cst_5 : f32 to vector<4x4xf32>
    %5 = arith.maximumf %3, %4 : vector<4x4xf32>
    %c0_6 = arith.constant 0 : index
    %c0_7 = arith.constant 0 : index
    %6 = vector.load %arg3[%c0_6, %c0_7] : memref<4x72xf32, #tpu.memory_space<vmem>>, vector<4x72xf32>
    %cst_8 = arith.constant dense<0.000000e+00> : vector<4x72xf32>
    %7 = tpu.matmul %5, %6, %cst_8 {dimension_numbers = #tpu.dot_dimension_numbers<[1], [0], [0], [1], [0, 0, 1, 1], [], []>} : vector<4x4xf32>, vector<4x72xf32>, vector<4x72xf32> -> vector<4x72xf32>
    %cst_9 = arith.constant 0.000000e+00 : f32
    %8 = vector.broadcast %cst_9 : f32 to vector<4x72xf32>
    %9 = arith.subf %8, %7 : vector<4x72xf32>
    %10 = math.exp %9 : vector<4x72xf32>
    %cst_10 = arith.constant 1.000000e+00 : f32
    %11 = vector.broadcast %cst_10 : f32 to vector<4x72xf32>
    %12 = arith.addf %11, %10 : vector<4x72xf32>
    %cst_11 = arith.constant 1.000000e+00 : f32
    %13 = vector.broadcast %cst_11 : f32 to vector<4x72xf32>
    %14 = arith.divf %13, %12 : vector<4x72xf32>
    %15 = vector.shape_cast %14 : vector<4x72xf32> to vector<4x72x1xf32>
    %16 = vector.broadcast %15 : vector<4x72x1xf32> to vector<4x72x256xf32>
    %17 = arith.mulf %0, %16 : vector<4x72x256xf32>
    %c0_12 = arith.constant 0 : index
    %c0_13 = arith.constant 0 : index
    %c0_14 = arith.constant 0 : index
    %18 = vector.load %arg4[%c0_12, %c0_13, %c0_14] : memref<4x72x256xf32, #tpu.memory_space<vmem>>, vector<4x72x256xf32>
    tpu.vector_store %arg4[%c0_12, %c0_13, %c0_14], %17 {strides = array<i32>} : memref<4x72x256xf32, #tpu.memory_space<vmem>>, vector<4x72x256xf32>,
    return
  }
  func.func @transform_0(%arg0: i32) -> (i32, i32, i32) {
    %c0_i32 = arith.constant 0 : i32
    %c0_i32_0 = arith.constant 0 : i32
    %c0_i32_1 = arith.constant 0 : i32
    return %arg0, %c0_i32, %c0_i32_0 : i32, i32, i32
  }
  func.func @transform_1(%arg0: i32) -> (i32, i32) {
    %c0_i32 = arith.constant 0 : i32
    %c0_i32_0 = arith.constant 0 : i32
    %c0_i32_1 = arith.constant 0 : i32
    return %c0_i32, %c0_i32_0 : i32, i32
  }
  func.func @transform_2(%arg0: i32) -> (i32, i32) {
    %c0_i32 = arith.constant 0 : i32
    %c0_i32_0 = arith.constant 0 : i32
    %c0_i32_1 = arith.constant 0 : i32
    return %c0_i32, %c0_i32_0 : i32, i32
  }
  func.func @transform_3(%arg0: i32) -> (i32, i32, i32) {
    %c0_i32 = arith.constant 0 : i32
    %c0_i32_0 = arith.constant 0 : i32
    %c0_i32_1 = arith.constant 0 : i32
    return %arg0, %c0_i32, %c0_i32_0 : i32, i32, i32
  }
}

</mosaic_0001>

<bundles_post_ra>
// kernel: se_layer.1
= control target key start
LH: loop header
LB: loop body
LE: loop exit
PB: predicated region body
PF: predicated region fallthrough
CT: control target
= control target key end

     0   :  { %s1218_s12 = smov 0   ;;  %s1880_s0 = inlined_call_operand.vmem [shape: f32[8,72,256], index: 0, kind: input, shape index: {}, may-alias: {0,3}]   ;;  %s1881_s1 = inlined_call_operand.vmem [shape: f32[72,4], index: 1, kind: input, shape index: {}]   ;;  %s1882_s2 = inlined_call_operand.vmem [shape: f32[4,72], index: 2, kind: input, shape index: {}]   ;;  %s1883_s3 = inlined_call_operand.vmem [shape: f32[8,72,256], index: 3, kind: output, shape index: {}, may-alias: {0,3}]  }
   0x1 LB: > { %s1121_s13 = sadd.s32 4294967295, %s1194_s12   ;;  %p1125_p0 = scmp.ge.s32.totalorder %s1194_s12, 1  ;;  %s1194_s12 = sphi %s1218_s12, %s13_s12  }
   0x2   : > { %p139_p1 = scmp.lt.s32.totalorder %s1194_s12, 3 }
   0x4   : > { %p140_p2 = pnand %p1125_p0, %p139_p1 }
   0x6   : > { %143 = sbr.rel (%p140_p2) target bundleno = 847 (0x34f), region = 32 }
   0xb   : > { %s1126_s14 = sshll.u32 %s1121_s13, 2  ;;  %vm1197_vm0 = vmmov 0   ;;  %vm415_vm1 = vcmask 130112   ;;  %vm422_vm2 = vcmask 195712   ;;  %vm429_vm3 = vcmask 261312  }
   0xc   : > { %p166_p3 = scmp.lt.s32.totalorder %s1126_s14, 7  ;;  %vm436_vm4 = vcmask 326912   ;;  %vm443_vm5 = vcmask 392512   ;;  %vm450_vm6 = vcmask 458112   ;;  %vm457_vm7 = vcmask 523712  }
   0xd   : > { %vm464_vm8 = vcmask 589312   ;;  %vm598_vm9 = vcmask 1041409   ;;  %vm600_vm10 = vcmask 1042434   ;;  %vm602_vm11 = vcmask 1043459  }
   0xe   : > { %s2053_s14 = smov (!%p166_p3, %s1126_s14), 7  ;;  %vm604_vm12 = vcmask 588800   ;;  %vm683_vm13 = vcmask 1043456   ;;  %vm679_vm14 = vcmask 31744  }
   0xf   : > { %s1173_s15 = smul.u32 144, %s2053_s14 }
  0x11   : > { %s1234_s18 = scalar_lea.vmem %s1880_s0, %s1173_s15  ;;  %s1731_s17 = scalar_lea.vmem %s1883_s3, %s1173_s15 }
  0x12   : > { %v1237_v0 = vld [vmem:[%s1234_s18 + $0x90] sm:$0xff]  ;;  %v1240_v1 = vld [vmem:[%s1234_s18 + $0x98] sm:$0xff]  ;;  %v1243_v2 = vld [vmem:[%s1234_s18] sm:$0xff] }
  0x13   : > { %1940 = vst [vmem:[#allocation2_spill] sm:$0xff] %v1237_v0  ;;  %1941 = vst [vmem:[#allocation3_spill] sm:$0xff] %v1240_v1  ;;  %v278_v3 = vadd.f32 %v1240_v1, %v1237_v0  ;;  %v1248_v4 = vld [vmem:[%s1234_s18 + $0x8] sm:$0xff]  ;;  %v1251_v5 = vld [vmem:[%s1234_s18 + $0xa0] sm:$0xff] }
  0x14   : > { %1942 = vst [vmem:[#allocation4_spill] sm:$0xff] %v1251_v5  ;;  %v1254_v6 = vld [vmem:[%s1234_s18 + $0xa8] sm:$0xff]  ;;  %v251_v7 = vadd.f32 %v1248_v4, %v1243_v2  ;;  %v1259_v8 = vld [vmem:[%s1234_s18 + $0x10] sm:$0xff]  ;;  %v1262_v9 = vld [vmem:[%s1234_s18 + $0x18] sm:$0xff] }
  0x15   : > { %1943 = vst [vmem:[#allocation5_spill] sm:$0xff] %v1254_v6  ;;  %279 = vadd.xlane.f32.xlu1 %v278_v3  ;;  %v281_v10 = vadd.f32 %v1254_v6, %v1251_v5  ;;  %v254_v11 = vadd.f32 %v1262_v9, %v1259_v8  ;;  %v1269_v12 = vld [vmem:[%s1234_s18 + $0xb0] sm:$0xff]  ;;  %v1272_v13 = vld [vmem:[%s1234_s18 + $0xb8] sm:$0xff]  ;;  %v1275_v14 = vld [vmem:[%s1234_s18 + $0x20] sm:$0xff] }
  0x16   : > { %252 = vadd.xlane.f32.xlu0 %v251_v7  ;;  %1944 = vst [vmem:[#allocation6_spill] sm:$0xff] %v1269_v12  ;;  %1945 = vst [vmem:[#allocation7_spill] sm:$0xff] %v1272_v13  ;;  %v1278_v15 = vld [vmem:[%s1234_s18 + $0x28] sm:$0xff]  ;;  %v284_v16 = vadd.f32 %v1272_v13, %v1269_v12  ;;  %v1285_v18 = vld [vmem:[%s1234_s18 + $0x130] sm:$0xff] }
  0x17   : > { %v257_v17 = vadd.f32 %v1278_v15, %v1275_v14  ;;  %1946 = vst [vmem:[#allocation8_spill] sm:$0xff] %v1285_v18  ;;  %v1288_v19 = vld [vmem:[%s1234_s18 + $0x138] sm:$0xff]  ;;  %v1291_v20 = vld [vmem:[%s1234_s18 + $0x120] sm:$0xff]  ;;  %v1294_v21 = vld [vmem:[%s1234_s18 + $0x128] sm:$0xff] }
  0x18   : > { %1947 = vst [vmem:[#allocation9_spill] sm:$0xff] %v1288_v19  ;;  %1948 = vst [vmem:[#allocation10_spill] sm:$0xff] %v1291_v20  ;;  %v308_v22 = vadd.f32 %v1288_v19, %v1285_v18  ;;  %v305_v23 = vadd.f32 %v1294_v21, %v1291_v20  ;;  %v1301_v24 = vld [vmem:[%s1234_s18 + $0xc0] sm:$0xff]  ;;  %v1304_v25 = vld [vmem:[%s1234_s18 + $0xc8] sm:$0xff] }
  0x19   : > { %282 = vadd.xlane.f32.xlu1 %v281_v10  ;;  %1949 = vst [vmem:[#allocation11_spill] sm:$0xff] %v1294_v21  ;;  %1950 = vst [vmem:[#allocation12_spill] sm:$0xff] %v1301_v24  ;;  %v1307_v26 = vld [vmem:[%s1234_s18 + $0x30] sm:$0xff]  ;;  %v1310_v27 = vld [vmem:[%s1234_s18 + $0x38] sm:$0xff]  ;;  %v287_v28 = vadd.f32 %v1304_v25, %v1301_v24 }
  0x1a   : > { %255 = vadd.xlane.f32.xlu0 %v254_v11  ;;  %1951 = vst [vmem:[#allocation13_spill] sm:$0xff] %v1304_v25  ;;  %v260_v29 = vadd.f32 %v1310_v27, %v1307_v26  ;;  %v1317_v30 = vld [vmem:[%s1234_s18 + $0x1b0] sm:$0xff]  ;;  %v1320_v31 = vld [vmem:[%s1234_s18 + $0x1b8] sm:$0xff]  ;;  %v1323_v32 = vld [vmem:[%s1234_s18 + $0x140] sm:$0xff] }
  0x1b   : > { %1952 = vst [vmem:[#allocation14_spill] sm:$0xff] %v1317_v30  ;;  %1953 = vst [vmem:[#allocation15_spill] sm:$0xff] %v1320_v31  ;;  %v1326_v33 = vld [vmem:[%s1234_s18 + $0x148] sm:$0xff]  ;;  %v332_v34 = vadd.f32 %v1320_v31, %v1317_v30  ;;  %v1333_v36 = vld [vmem:[%s1234_s18 + $0x40] sm:$0xff] }
  0x1c   : > { %1954 = vst [vmem:[#allocation16_spill] sm:$0xff] %v1323_v32  ;;  %1955 = vst [vmem:[#allocation17_spill] sm:$0xff] %v1326_v33  ;;  %v311_v35 = vadd.f32 %v1326_v33, %v1323_v32  ;;  %v1336_v37 = vld [vmem:[%s1234_s18 + $0x48] sm:$0xff]  ;;  %v1339_v38 = vld [vmem:[%s1234_s18 + $0x1c0] sm:$0xff] }
  0x1d   : > { %285 = vadd.xlane.f32.xlu1 %v284_v16  ;;  %1956 = vst [vmem:[#allocation18_spill] sm:$0xff] %v1339_v38  ;;  %v1342_v39 = vld [vmem:[%s1234_s18 + $0x1c8] sm:$0xff]  ;;  %v263_v40 = vadd.f32 %v1336_v37, %v1333_v36  ;;  %v1349_v42 = vld [vmem:[%s1234_s18 + $0x150] sm:$0xff]  ;;  %v1352_v43 = vld [vmem:[%s1234_s18 + $0x158] sm:$0xff] }
  0x1e   : > { %258 = vadd.xlane.f32.xlu0 %v257_v17  ;;  %1957 = vst [vmem:[#allocation19_spill] sm:$0xff] %v1342_v39  ;;  %v335_v41 = vadd.f32 %v1342_v39, %v1339_v38  ;;  %1958 = vst [vmem:[#allocation20_spill] sm:$0xff] %v1349_v42  ;;  %v1355_v44 = vld [vmem:[%s1234_s18 + $0xd0] sm:$0xff]  ;;  %v1358_v45 = vld [vmem:[%s1234_s18 + $0xd8] sm:$0xff]  ;;  %v314_v46 = vadd.f32 %v1352_v43, %v1349_v42 }
  0x1f   : > { %1959 = vst [vmem:[#allocation21_spill] sm:$0xff] %v1352_v43  ;;  %1960 = vst [vmem:[#allocation22_spill] sm:$0xff] %v1355_v44  ;;  %v290_v47 = vadd.f32 %v1358_v45, %v1355_v44  ;;  %v1365_v48 = vld [vmem:[%s1234_s18 + $0x50] sm:$0xff]  ;;  %v1368_v49 = vld [vmem:[%s1234_s18 + $0x58] sm:$0xff] }
  0x20   : > { %1961 = vst [vmem:[#allocation23_spill] sm:$0xff] %v1358_v45  ;;  %v1371_v50 = vld [vmem:[%s1234_s18 + $0x1d0] sm:$0xff]  ;;  %v1374_v51 = vld [vmem:[%s1234_s18 + $0x1d8] sm:$0xff]  ;;  %v266_v52 = vadd.f32 %v1368_v49, %v1365_v48  ;;  %v1381_v54 = vld [vmem:[%s1234_s18 + $0x160] sm:$0xff] }
  0x21   : > { %309 = vadd.xlane.f32.xlu1 %v308_v22  ;;  %1962 = vst [vmem:[#allocation24_spill] sm:$0xff] %v1371_v50  ;;  %1963 = vst [vmem:[#allocation25_spill] sm:$0xff] %v1374_v51  ;;  %v338_v53 = vadd.f32 %v1374_v51, %v1371_v50  ;;  %v1384_v55 = vld [vmem:[%s1234_s18 + $0x168] sm:$0xff]  ;;  %v1387_v56 = vld [vmem:[%s1234_s18 + $0xe0] sm:$0xff] }
  0x22   : > { %306 = vadd.xlane.f32.xlu0 %v305_v23  ;;  %1964 = vst [vmem:[#allocation26_spill] sm:$0xff] %v1381_v54  ;;  %1965 = vst [vmem:[#allocation27_spill] sm:$0xff] %v1384_v55  ;;  %v1390_v57 = vld [vmem:[%s1234_s18 + $0xe8] sm:$0xff]  ;;  %v317_v58 = vadd.f32 %v1384_v55, %v1381_v54  ;;  %v1397_v60 = vld [vmem:[%s1234_s18 + $0x60] sm:$0xff]  ;;  %v404_v55 = vlaneseq }
  0x23   : > { %1966 = vst [vmem:[#allocation28_spill] sm:$0xff] %v1387_v56  ;;  %1967 = vst [vmem:[#allocation29_spill] sm:$0xff] %v1390_v57  ;;  %v293_v59 = vadd.f32 %v1390_v57, %v1387_v56  ;;  %v1400_v61 = vld [vmem:[%s1234_s18 + $0x68] sm:$0xff]  ;;  %v1403_v62 = vld [vmem:[%s1234_s18 + $0x1e0] sm:$0xff] }
  0x24   : > { %1968 = vst [vmem:[#allocation30_spill] sm:$0xff] %v1403_v62  ;;  %v1406_v63 = vld [vmem:[%s1234_s18 + $0x1e8] sm:$0xff]  ;;  %v269_v3 = vadd.f32 %v1400_v61, %v1397_v60  ;;  %v1413_v10 = vld [vmem:[%s1234_s18 + $0x170] sm:$0xff]  ;;  %v1416_v11 = vld [vmem:[%s1234_s18 + $0x178] sm:$0xff]  ;;  %v405_v18 = vand.u32 127, %v404_v55 }
  0x25   : > { %288 = vadd.xlane.f32.xlu1 %v287_v28  ;;  %1969 = vst [vmem:[#allocation31_spill] sm:$0xff] %v1406_v63  ;;  %v341_v7 = vadd.f32 %v1406_v63, %v1403_v62  ;;  %1970 = vst [vmem:[#allocation32_spill] sm:$0xff] %v1413_v10  ;;  %v1419_v16 = vld [vmem:[%s1234_s18 + $0xf0] sm:$0xff]  ;;  %v1422_v17 = vld [vmem:[%s1234_s18 + $0xf8] sm:$0xff]  ;;  %v320_v22 = vadd.f32 %v1416_v11, %v1413_v10 }
  0x26   : > { %261 = vadd.xlane.f32.xlu0 %v260_v29  ;;  %1971 = vst [vmem:[#allocation33_spill] sm:$0xff] %v1416_v11  ;;  %1972 = vst [vmem:[#allocation34_spill] sm:$0xff] %v1419_v16  ;;  %v296_v23 = vadd.f32 %v1422_v17, %v1419_v16  ;;  %v1429_v28 = vld [vmem:[%s1234_s18 + $0x70] sm:$0xff]  ;;  %v1432_v29 = vld [vmem:[%s1234_s18 + $0x78] sm:$0xff]  ;;  %v417_v21 = vadd.s32 4294967280, %v405_v18  ;;  %v424_v20 = vadd.s32 4294967272, %v405_v18 }
  0x27   : > { %1973 = vst [vmem:[#allocation35_spill] sm:$0xff] %v1422_v17  ;;  %1974 = vst [vmem:[#allocation36_spill] sm:$0xff] %v1429_v28  ;;  %v1483_v51 = vld [vmem:[%s1234_s18 + $0x110] sm:$0xff]  ;;  %v1486_v50 = vld [vmem:[%s1234_s18 + $0x118] sm:$0xff]  ;;  %v431_v16 = vadd.s32 4294967264, %v405_v18  ;;  %v445_v44 = vadd.s32 4294967248, %v405_v18 }
  0x28   : > { %1975 = vst [vmem:[#allocation37_spill] sm:$0xff] %v1432_v29  ;;  %1986 = vst [vmem:[#allocation48_spill] sm:$0xff] %v1483_v51  ;;  %v1499_v63 = vld [vmem:[%s1234_s18 + $0x210] sm:$0xff]  ;;  %v1502_v62 = vld [vmem:[%s1234_s18 + $0x218] sm:$0xff]  ;;  %v452_v57 = vadd.s32 4294967240, %v405_v18  ;;  %v459_v12 = vadd.s32 4294967232, %v405_v18 }
  0x29   : > { %333 = vadd.xlane.f32.xlu1 %v332_v34  ;;  %v1435_v34 = vld [vmem:[%s1234_s18 + $0x1f0] sm:$0xff]  ;;  %1987 = vst [vmem:[#allocation49_spill] sm:$0xff] %v1486_v50  ;;  %1990 = vst [vmem:[#allocation52_spill] sm:$0xff] %v1499_v63  ;;  %v1512_v30 = vld [vmem:[%s1234_s18 + $0x238] sm:$0xff] }
  0x2a   : > { %312 = vadd.xlane.f32.xlu0 %v311_v35  ;;  %1976 = vst [vmem:[#allocation38_spill] sm:$0xff] %v1435_v34  ;;  %v1438_v35 = vld [vmem:[%s1234_s18 + $0x1f8] sm:$0xff]  ;;  %1991 = vst [vmem:[#allocation53_spill] sm:$0xff] %v1502_v62  ;;  %v1515_v39 = vld [vmem:[%s1234_s18 + $0x220] sm:$0xff] }
  0x2b   : > { %1977 = vst [vmem:[#allocation39_spill] sm:$0xff] %v1438_v35  ;;  %1993 = vst [vmem:[#allocation55_spill] sm:$0xff] %v1512_v30  ;;  %v1518_v38 = vld [vmem:[%s1234_s18 + $0x228] sm:$0xff] }
  0x2c   : > { %1994 = vst [vmem:[#allocation56_spill] sm:$0xff] %v1515_v39  ;;  %1995 = vst [vmem:[#allocation57_spill] sm:$0xff] %v1518_v38 }
  0x2d   : > { %264 = vadd.xlane.f32.xlu1 %v263_v40  ;;  %v272_v40 = vadd.f32 %v1432_v29, %v1429_v28 }
  0x2e   : > { %336 = vadd.xlane.f32.xlu0 %v335_v41  ;;  %v344_v41 = vadd.f32 %v1438_v35, %v1435_v34  ;;  %v1477_v35 = vld [vmem:[%s1234_s18 + $0x190] sm:$0xff]  ;;  %v1480_v34 = vld [vmem:[%s1234_s18 + $0x198] sm:$0xff] }
  0x2f   : > { %1984 = vst [vmem:[#allocation46_spill] sm:$0xff] %v1477_v35  ;;  %1985 = vst [vmem:[#allocation47_spill] sm:$0xff] %v1480_v34 }
  0x31   : > { %315 = vadd.xlane.f32.xlu1 %v314_v46  ;;  %v1445_v46 = vld [vmem:[%s1234_s18 + $0x180] sm:$0xff] }
  0x32   : > { %291 = vadd.xlane.f32.xlu0 %v290_v47  ;;  %1978 = vst [vmem:[#allocation40_spill] sm:$0xff] %v1445_v46  ;;  %v1448_v47 = vld [vmem:[%s1234_s18 + $0x188] sm:$0xff] }
  0x33   : > { %1979 = vst [vmem:[#allocation41_spill] sm:$0xff] %v1448_v47 }
  0x35   : > { %267 = vadd.xlane.f32.xlu1 %v266_v52  ;;  %v1451_v52 = vld [vmem:[%s1234_s18 + $0x100] sm:$0xff] }
  0x36   : > { %339 = vadd.xlane.f32.xlu0 %v338_v53  ;;  %1980 = vst [vmem:[#allocation42_spill] sm:$0xff] %v1451_v52  ;;  %v1454_v53 = vld [vmem:[%s1234_s18 + $0x108] sm:$0xff] }
  0x37   : > { %1981 = vst [vmem:[#allocation43_spill] sm:$0xff] %v1454_v53 }
  0x39   : > { %318 = vadd.xlane.f32.xlu1 %v317_v58  ;;  %v323_v58 = vadd.f32 %v1448_v47, %v1445_v46 }
  0x3a   : > { %294 = vadd.xlane.f32.xlu0 %v293_v59  ;;  %v299_v59 = vadd.f32 %v1454_v53, %v1451_v52  ;;  %v438_v53 = vadd.s32 4294967256, %v405_v18 }
  0x3d   : > { %270 = vadd.xlane.f32.xlu1 %v269_v3  ;;  %v1461_v3 = vld [vmem:[%s1234_s18 + $0x80] sm:$0xff] }
  0x3e   : > { %342 = vadd.xlane.f32.xlu0 %v341_v7  ;;  %v1464_v7 = vld [vmem:[%s1234_s18 + $0x88] sm:$0xff] }
  0x41   : > { %321 = vadd.xlane.f32.xlu1 %v320_v22  ;;  %v1467_v22 = vld [vmem:[%s1234_s18 + $0x200] sm:$0xff] }
  0x42   : > { %297 = vadd.xlane.f32.xlu0 %v296_v23  ;;  %1982 = vst [vmem:[#allocation44_spill] sm:$0xff] %v1467_v22  ;;  %v1470_v23 = vld [vmem:[%s1234_s18 + $0x208] sm:$0xff] }
  0x43   : > { %1983 = vst [vmem:[#allocation45_spill] sm:$0xff] %v1470_v23 }
  0x45   : > { %273 = vadd.xlane.f32.xlu1 %v272_v40  ;;  %v275_v40 = vadd.f32 %v1464_v7, %v1461_v3 }
  0x46   : > { %345 = vadd.xlane.f32.xlu0 %v344_v41  ;;  %v347_v41 = vadd.f32 %v1470_v23, %v1467_v22  ;;  %v1493_v23 = vld [vmem:[%s1234_s18 + $0x1a0] sm:$0xff]  ;;  %v1496_v22 = vld [vmem:[%s1234_s18 + $0x1a8] sm:$0xff] }
  0x47   : > { %1988 = vst [vmem:[#allocation50_spill] sm:$0xff] %v1493_v23  ;;  %1989 = vst [vmem:[#allocation51_spill] sm:$0xff] %v1496_v22  ;;  %v329_v31 = vadd.f32 %v1496_v22, %v1493_v23 }
  0x49   : > { %324 = vadd.xlane.f32.xlu1 %v323_v58  ;;  %v326_v58 = vadd.f32 %v1480_v34, %v1477_v35 }
  0x4a   : > { %300 = vadd.xlane.f32.xlu0 %v299_v59  ;;  %v302_v59 = vadd.f32 %v1486_v50, %v1483_v51  ;;  %v410_v50 = vadd.s32 4294967288, %v405_v18  ;;  %v1599_v51 = vshrl.u32 %v404_v55, 7 }
  0x4c   : > { %v413_v45 = vsub.s32 %v410_v50, %v1599_v51  ;;  %v408_v56 = vsub.s32 %v405_v18, %v1599_v51  ;;  %v420_v13 = vsub.s32 %v417_v21, %v1599_v51  ;;  %v1609_v55 = vsub.s32 %v424_v20, %v1599_v51 }
  0x4d   : > { %276 = vadd.xlane.f32.xlu1 %v275_v40  ;;  %v350_v40 = vadd.f32 %v1502_v62, %v1499_v63  ;;  %v367_v62 = vld [vmem:[%s1881_s1 + $0x40] sm:$0xff]  ;;  %v1614_v24 = vsub.s32 %v431_v16, %v1599_v51  ;;  %v1617_v50 = vsub.s32 %v438_v53, %v1599_v51  ;;  %v1623_v18 = vsub.s32 %v445_v44, %v1599_v51 }
  0x4e   : > { %348 = vadd.xlane.f32.xlu0 %v347_v41  ;;  %v1509_v41 = vld [vmem:[%s1234_s18 + $0x230] sm:$0xff]  ;;  %v1626_v20 = vsub.s32 %v452_v57, %v1599_v51  ;;  %v1632_v53 = vsub.s32 %v459_v12, %v1599_v51 }
  0x4f   : > { %1992 = vst [vmem:[#allocation54_spill] sm:$0xff] %v1509_v41  ;;  %v356_v34 = vadd.f32 %v1512_v30, %v1509_v41  ;;  %v364_v30 = vld [vmem:[%s1881_s1 + $0x28] sm:$0xff] }
  0x51   : > { %327 = vadd.xlane.f32.xlu1 %v326_v58  ;;  %v353_v58 = vadd.f32 %v1518_v38, %v1515_v39 }
  0x52   : > { %303 = vadd.xlane.f32.xlu0 %v302_v59  ;;  %v1196_v59 = vmov 0.0  }
  0x53   : > { %1147 = vmatprep.subr.mxu0 %v1196_v59  ;;  %1168 = vmatprep.subr.mxu1 %v1196_v59 }
  0x54   : > { %1148 = vmatpush3.msra.mxu0 %v367_v62  ;;  %v363_v62 = vld [vmem:[%s1881_s1 + $0x20] sm:$0xff]  ;;  %1165 = vmatprep.mubr.msk.f32.mxu0 %vm1197_vm0, %v1196_v59 }
  0x55   : > { %330 = vadd.xlane.f32.xlu1 %v329_v31  ;;  %1149 = vmatprep.subr.mxu0 %v1196_v59  ;;  %v366_v31 = vld [vmem:[%s1881_s1 + $0x38] sm:$0xff] }
  0x56   : > { %351 = vadd.xlane.f32.xlu0 %v350_v40  ;;  %1150 = vmatpush3.msra.mxu0 %v366_v31  ;;  %v365_v40 = vld [vmem:[%s1881_s1 + $0x30] sm:$0xff]  ;;  %v359_v31 = vld [vmem:[%s1881_s1] sm:$0xff] }
  0x57   : > { %1151 = vmatprep.subr.mxu0 %v1196_v59  ;;  %1170 = vmatprep.mubr.msk.f32.mxu1 %vm1197_vm0, %v1196_v59 }
  0x58   : > { %1152 = vmatpush3.msra.mxu0 %v365_v40 }
  0x59   : > { %357 = vadd.xlane.f32.xlu1 %v356_v34  ;;  %1153 = vmatprep.subr.mxu0 %v1196_v59  ;;  %v362_v34 = vld [vmem:[%s1881_s1 + $0x18] sm:$0xff] }
  0x5a   : > { %354 = vadd.xlane.f32.xlu0 %v353_v58  ;;  %1154 = vmatpush3.msra.mxu0 %v364_v30  ;;  %v361_v58 = vld [vmem:[%s1881_s1 + $0x10] sm:$0xff]  ;;  %v360_v30 = vld [vmem:[%s1881_s1 + $0x8] sm:$0xff] }
  0x5b   : > { %1155 = vmatprep.subr.mxu0 %v1196_v59 }
  0x5c   : > { %1156 = vmatpush3.msra.mxu0 %v363_v62 }
  0x5d   : > { %1157 = vmatprep.subr.mxu0 %v1196_v59 }
  0x5e   : > { %1158 = vmatpush3.msra.mxu0 %v362_v34 }
  0x5f   : > { %1159 = vmatprep.subr.mxu0 %v1196_v59 }
  0x60   : > { %1160 = vmatpush3.msra.mxu0 %v361_v58 }
  0x61   : > { %1161 = vmatprep.subr.mxu0 %v1196_v59 }
  0x62   : > { %1162 = vmatpush3.msra.mxu0 %v360_v30 }
  0x63   : > { %1163 = vmatprep.subr.mxu0 %v1196_v59 }
  0x64   : > { %1164 = vmatpush3.msra.mxu0 %v359_v31 }
  0x9e   : > { %v1551_v40 = vpop.xlane.xlu1 %279 }
  0x9f   : > { %v1553_v62 = vpop.xlane.xlu0 %252 }
  0xa0   : > { %v409_v0 = vrot.slane %v1553_v62, %v408_v56  ;;  %v469_v62 = vrot.slane %v1551_v40, %v408_v56 }
  0xa2   : > { %v1555_v34 = vpop.xlane.xlu1 %282 }
  0xa3   : > { %v1557_v58 = vpop.xlane.xlu0 %255  ;;  %v473_v16 = vrot.slane %v1555_v34, %v413_v45 }
  0xa4   : > { %v414_v21 = vrot.slane %v1557_v58, %v413_v45 }
  0xa5   : > { %v474_v28 = vsel %vm415_vm1, %v473_v16, %v469_v62 }
  0xa6   : > { %v1559_v41 = vpop.xlane.xlu1 %285 }
  0xa7   : > { %v1561_v30 = vpop.xlane.xlu0 %258  ;;  %v478_v5 = vrot.slane %v1559_v41, %v420_v13 }
  0xa8   : > { %v421_v6 = vrot.slane %v1561_v30, %v420_v13 }
  0xaa   : > { %v1563_v63 = vpop.xlane.xlu1 %309 }
  0xab   : > { %v1565_v38 = vpop.xlane.xlu0 %306  ;;  %v517_v58 = vrot.slane %v1563_v63, %v413_v45  ;;  %v416_v63 = vsel %vm415_vm1, %v414_v21, %v409_v0  ;;  %v479_v0 = vsel %vm422_vm2, %v478_v5, %v474_v28 }
  0xac   : > { %v513_v29 = vrot.slane %v1565_v38, %v408_v56 }
  0xae   : > { %v1567_v31 = vpop.xlane.xlu1 %288 }
  0xaf   : > { %v1569_v39 = vpop.xlane.xlu0 %261  ;;  %v483_v34 = vrot.slane %v1567_v31, %v1609_v55  ;;  %v423_v31 = vsel %vm422_vm2, %v421_v6, %v416_v63 }
  0xb0   : > { %v428_v44 = vrot.slane %v1569_v39, %v1609_v55 }
  0xb1   : > { %v484_v21 = vsel %vm429_vm3, %v483_v34, %v479_v0 }
  0xb2   : > { %v1571_v59 = vpop.xlane.xlu1 %333 }
  0xb3   : > { %v1573_v35 = vpop.xlane.xlu0 %312 }
  0xb4   : > { %v522_v30 = vrot.slane %v1573_v35, %v420_v13 }
  0xb6   : > { %v1575_v22 = vpop.xlane.xlu1 %264 }
  0xb7   : > { %v1577_v23 = vpop.xlane.xlu0 %336  ;;  %v435_v12 = vrot.slane %v1575_v22, %v1614_v24 }
  0xb8   : > { %v561_v38 = vrot.slane %v1577_v23, %v413_v45  ;;  %v518_v45 = vsel %vm415_vm1, %v517_v58, %v513_v29  ;;  %v430_v23 = vsel %vm429_vm3, %v428_v44, %v423_v31 }
  0xb9   : > { %v523_v6 = vsel %vm422_vm2, %v522_v30, %v518_v45  ;;  %v437_v16 = vsel %vm436_vm4, %v435_v12, %v430_v23 }
  0xba   : > { %v1579_v11 = vpop.xlane.xlu1 %315 }
  0xbb   : > { %v1581_v10 = vpop.xlane.xlu0 %291  ;;  %v527_v39 = vrot.slane %v1579_v11, %v1609_v55  ;;  %v557_v11 = vrot.slane %v1571_v59, %v408_v56 }
  0xbc   : > { %v488_v40 = vrot.slane %v1581_v10, %v1614_v24 }
  0xbd   : > { %v562_v5 = vsel %vm415_vm1, %v561_v38, %v557_v11  ;;  %v528_v28 = vsel %vm429_vm3, %v527_v39, %v523_v6 }
  0xbe   : > { %v1583_v47 = vpop.xlane.xlu1 %267  ;;  %v489_v29 = vsel %vm436_vm4, %v488_v40, %v484_v21 }
  0xbf   : > { %v1585_v46 = vpop.xlane.xlu0 %339  ;;  %v442_v35 = vrot.slane %v1583_v47, %v1617_v50 }
  0xc0   : > { %v566_v22 = vrot.slane %v1585_v46, %v420_v13 }
  0xc1   : > { %v444_v47 = vsel %vm443_vm5, %v442_v35, %v437_v16 }
  0xc2   : > { %v1587_v43 = vpop.xlane.xlu1 %318  ;;  %v567_v59 = vsel %vm422_vm2, %v566_v22, %v562_v5 }
  0xc3   : > { %v1589_v42 = vpop.xlane.xlu0 %294  ;;  %v532_v13 = vrot.slane %v1587_v43, %v1614_v24 }
  0xc4   : > { %v493_v56 = vrot.slane %v1589_v42, %v1617_v50 }
  0xc5   : > { %v533_v12 = vsel %vm436_vm4, %v532_v13, %v528_v28 }
  0xc6   : > { %v1591_v54 = vpop.xlane.xlu1 %270  ;;  %v494_v38 = vsel %vm443_vm5, %v493_v56, %v489_v29 }
  0xc7   : > { %v1593_v19 = vpop.xlane.xlu0 %342  ;;  %v449_v44 = vrot.slane %v1591_v54, %v1623_v18 }
  0xc8   : > { %v571_v62 = vrot.slane %v1593_v19, %v1609_v55 }
  0xc9   : > { %v451_v40 = vsel %vm450_vm6, %v449_v44, %v444_v47 }
  0xca   : > { %v1595_v33 = vpop.xlane.xlu1 %321  ;;  %v572_v31 = vsel %vm429_vm3, %v571_v62, %v567_v59 }
  0xcb   : > { %v1597_v32 = vpop.xlane.xlu0 %297  ;;  %v537_v58 = vrot.slane %v1595_v33, %v1617_v50 }
  0xcc   : > { %v498_v43 = vrot.slane %v1597_v32, %v1623_v18 }
  0xcd   : > { %v538_v55 = vsel %vm443_vm5, %v537_v58, %v533_v12  ;;  %v804_v12 = vsub.s32 1, %v1599_v51 }
  0xce   : > { %v1601_v17 = vpop.xlane.xlu1 %273  ;;  %v499_v39 = vsel %vm450_vm6, %v498_v43, %v494_v38 }
  0xcf   : > { %v1603_v52 = vpop.xlane.xlu0 %345  ;;  %v456_v19 = vrot.slane %v1601_v17, %v1626_v20 }
  0xd0   : > { %v576_v33 = vrot.slane %v1603_v52, %v1614_v24 }
  0xd2   : > { %v1611_v25 = vpop.xlane.xlu1 %324 }
  0xd3   : > { %v1619_v1 = vpop.xlane.xlu0 %300  ;;  %v542_v42 = vrot.slane %v1611_v25, %v1623_v18 }
  0xd4   : > { %v503_v34 = vrot.slane %v1619_v1, %v1626_v20 }
  0xd5   : > { %v543_v35 = vsel %vm450_vm6, %v542_v42, %v538_v55  ;;  %v765_v42 = vsub.s32 0, %v1599_v51 }
  0xd6   : > { %v1639_v57 = vpop.xlane.xlu1 %276  ;;  %v504_v17 = vsel %vm457_vm7, %v503_v34, %v499_v39 }
  0xd7   : > { %v349_v41 = vpop.xlane.xlu0 %348  ;;  %v463_v24 = vrot.slane %v1639_v57, %v1632_v53 }
  0xd8   : > { %v581_v25 = vrot.slane %v349_v41, %v1617_v50  ;;  %v577_v41 = vsel %vm436_vm4, %v576_v33, %v572_v31 }
  0xda   : > { %v328_v10 = vpop.xlane.xlu1 %327  ;;  %v582_v23 = vsel %vm443_vm5, %v581_v25, %v577_v41 }
  0xdb   : > { %v304_v46 = vpop.xlane.xlu0 %303  ;;  %v547_v32 = vrot.slane %v328_v10, %v1626_v20 }
  0xdc   : > { %v508_v63 = vrot.slane %v304_v46, %v1632_v53 }
  0xdd   : > { %v548_v22 = vsel %vm457_vm7, %v547_v32, %v543_v35  ;;  %v843_v32 = vsub.s32 2, %v1599_v51 }
  0xde   : > { %v331_v30 = vpop.xlane.xlu1 %330  ;;  %v509_v0 = vsel %vm464_vm8, %v508_v63, %v504_v17 }
  0xdf   : > { %v352_v54 = vpop.xlane.xlu0 %351  ;;  %v552_v1 = vrot.slane %v331_v30, %v1632_v53 }
  0xe0   : > { %v586_v52 = vrot.slane %v352_v54, %v1623_v18  ;;  %v458_v18 = vsel %vm457_vm7, %v456_v19, %v451_v40  ;;  %v882_v54 = vsub.s32 3, %v1599_v51 }
  0xe1   : > { %v553_v11 = vsel %vm464_vm8, %v552_v1, %v548_v22  ;;  %v465_v21 = vsel %vm464_vm8, %v463_v24, %v458_v18  ;;  %v1996_v22 = vld [vmem:[#allocation36_spill] sm:$0xff]  ;;  %v1999_v18 = vld [vmem:[#allocation5_spill] sm:$0xff] }
  0xe2   : > { %v358_v50 = vpop.xlane.xlu1 %357  ;;  %v587_v6 = vsel %vm450_vm6, %v586_v52, %v582_v23  ;;  %v599_v16 = vsel %vm598_vm9, %v509_v0, %v465_v21  ;;  %v2001_v21 = vld [vmem:[#allocation3_spill] sm:$0xff] }
  0xe3   : > { %v355_v45 = vpop.xlane.xlu0 %354  ;;  %v596_v57 = vrot.slane %v358_v50, %v1632_v53  ;;  %v601_v46 = vsel %vm600_vm10, %v553_v11, %v599_v16  ;;  %v2000_v11 = vld [vmem:[#allocation2_spill] sm:$0xff]  ;;  %v2002_v16 = vld [vmem:[#allocation12_spill] sm:$0xff] }
  0xe4   : > { %v591_v10 = vrot.slane %v355_v45, %v1626_v20  ;;  %v678_v20 = vld [vmem:[%s1882_s2] sm:$0xf]  ;;  %v1997_v45 = vld [vmem:[#allocation37_spill] sm:$0xff] }
  0xe5   : > { %1169 = vmatpush3.msk.msra.mxu1 %vm683_vm13, %v678_v20 }
  0xe6   : > { %v592_v13 = vsel %vm457_vm7, %v591_v10, %v587_v6 }
  0xe7   : > { %v597_v53 = vsel %vm464_vm8, %v596_v57, %v592_v13  ;;  %v1998_v57 = vld [vmem:[#allocation4_spill] sm:$0xff] }
  0xe8   : > { %v603_v5 = vsel %vm602_vm11, %v597_v53, %v601_v46  ;;  %v2003_v53 = vld [vmem:[#allocation13_spill] sm:$0xff] }
  0xe9   : > { %1166 = vmatmul.mubr.msk.f32.vlgmr.msra.gmra.mxu0 %vm604_vm12, %v603_v5 }
 0x1a9   : > { %v673_v28 = vpop.f32.mrf.mxu0 }
 0x1aa   : > { %v677_v29 = vmax.f32 %v673_v28, 0.0  ;;  %v2004_v28 = vld [vmem:[#allocation6_spill] sm:$0xff] }
 0x1ab   : > { %v1167_v56 = vpop.f32.mrf.mxu0 }
 0x1ac   : > { %1171 = vmatmul.mubr.msk.f32.vlgmr.msra.gmra.mxu1 %vm679_vm14, %v677_v29  ;;  %v2005_v56 = vld [vmem:[#allocation7_spill] sm:$0xff] }
 0x26c   : > { %v753_v47 = vpop.f32.mrf.mxu1 }
 0x26d   : > { %v757_v59 = vsub.f32 0.0, %v753_v47 }
 0x26e   : > { %v1172_v58 = vpop.f32.mrf.mxu1 }
 0x26f   : > { %v758_v43 = vmul.f32 1.442695, %v757_v59  ;;  %v2006_v59 = vld [vmem:[#allocation28_spill] sm:$0xff] }
 0x271   : > { %1184 = vpow2.f32 %v758_v43  ;;  %v2007_v43 = vld [vmem:[#allocation29_spill] sm:$0xff] }
 0x27e   : > { %v1185_v44 = vpop.eup %1184 }
 0x27f   : > { %v760_v62 = vadd.f32 1.0, %v1185_v44 }
 0x281   : > { %1186 = vrcp.f32 %v760_v62 }
 0x28e   : > { %v1187_v34 = vpop.eup %1186 }
 0x28f   : > { %v766_v30 = vrot.slane %v1187_v34, %v765_v42  ;;  %v805_v33 = vrot.slane %v1187_v34, %v804_v12  ;;  %v844_v63 = vrot.slane %v1187_v34, %v843_v32  ;;  %v883_v38 = vrot.slane %v1187_v34, %v882_v54  ;;  %v2008_v34 = vld [vmem:[#allocation22_spill] sm:$0xff]  ;;  %v2009_v12 = vld [vmem:[#allocation23_spill] sm:$0xff] }
 0x290   : > { %v2010_v32 = vld [vmem:[#allocation42_spill] sm:$0xff]  ;;  %v2011_v54 = vld [vmem:[#allocation43_spill] sm:$0xff] }
 0x291   : > { %772 = vbcast.lane.b32.xlu1 %v766_v30, 264  ;;  %768 = vbcast.lane.b32.xlu0 %v766_v30, 256 }
 0x295   : > { %776 = vbcast.lane.b32.xlu1 %v766_v30, 272  ;;  %784 = vbcast.lane.b32.xlu0 %v766_v30, 288 }
 0x299   : > { %780 = vbcast.lane.b32.xlu1 %v766_v30, 280  ;;  %792 = vbcast.lane.b32.xlu0 %v766_v30, 304 }
 0x29d   : > { %788 = vbcast.lane.b32.xlu1 %v766_v30, 296  ;;  %800 = vbcast.lane.b32.xlu0 %v766_v30, 320 }
 0x2a1   : > { %796 = vbcast.lane.b32.xlu1 %v766_v30, 312  ;;  %811 = vbcast.lane.b32.xlu0 %v805_v33, 264 }
 0x2a5   : > { %807 = vbcast.lane.b32.xlu1 %v805_v33, 256  ;;  %819 = vbcast.lane.b32.xlu0 %v805_v33, 280 }
 0x2a9   : > { %815 = vbcast.lane.b32.xlu1 %v805_v33, 272  ;;  %827 = vbcast.lane.b32.xlu0 %v805_v33, 296 }
 0x2ad   : > { %823 = vbcast.lane.b32.xlu1 %v805_v33, 288  ;;  %835 = vbcast.lane.b32.xlu0 %v805_v33, 312 }
 0x2b1   : > { %831 = vbcast.lane.b32.xlu1 %v805_v33, 304  ;;  %846 = vbcast.lane.b32.xlu0 %v844_v63, 256 }
 0x2b5   : > { %839 = vbcast.lane.b32.xlu1 %v805_v33, 320  ;;  %854 = vbcast.lane.b32.xlu0 %v844_v63, 272 }
 0x2b9   : > { %850 = vbcast.lane.b32.xlu1 %v844_v63, 264  ;;  %862 = vbcast.lane.b32.xlu0 %v844_v63, 288 }
 0x2bd   : > { %858 = vbcast.lane.b32.xlu1 %v844_v63, 280  ;;  %870 = vbcast.lane.b32.xlu0 %v844_v63, 304 }
 0x2c1   : > { %866 = vbcast.lane.b32.xlu1 %v844_v63, 296  ;;  %878 = vbcast.lane.b32.xlu0 %v844_v63, 320 }
 0x2c5   : > { %874 = vbcast.lane.b32.xlu1 %v844_v63, 312  ;;  %889 = vbcast.lane.b32.xlu0 %v883_v38, 264 }
 0x2c9   : > { %885 = vbcast.lane.b32.xlu1 %v883_v38, 256  ;;  %897 = vbcast.lane.b32.xlu0 %v883_v38, 280 }
 0x2cd   : > { %893 = vbcast.lane.b32.xlu1 %v883_v38, 272  ;;  %905 = vbcast.lane.b32.xlu0 %v883_v38, 296 }
 0x2d1   : > { %901 = vbcast.lane.b32.xlu1 %v883_v38, 288  ;;  %913 = vbcast.lane.b32.xlu0 %v883_v38, 312 }
 0x2d5   : > { %909 = vbcast.lane.b32.xlu1 %v883_v38, 304 }
 0x2d9   : > { %917 = vbcast.lane.b32.xlu1 %v883_v38, 320 }
 0x303   : > { %v773_v51 = vpop.permute.xlu1 %772  ;;  %v769_v19 = vpop.permute.xlu0 %768 }
 0x304   : > { %v921_v25 = vmul.f32 %v773_v51, %v1259_v8  ;;  %v922_v1 = vmul.f32 %v773_v51, %v1262_v9  ;;  %v919_v55 = vmul.f32 %v769_v19, %v1243_v2  ;;  %v920_v39 = vmul.f32 %v769_v19, %v1248_v4 }
 0x306   : > { %993 = vst [vmem:[%s1731_s17 + $0x10] sm:$0xff] %v921_v25  ;;  %994 = vst [vmem:[%s1731_s17 + $0x18] sm:$0xff] %v922_v1  ;;  %v2012_v25 = vld [vmem:[#allocation34_spill] sm:$0xff] }
 0x307   : > { %991 = vst [vmem:[%s1731_s17] sm:$0xff] %v919_v55  ;;  %992 = vst [vmem:[%s1731_s17 + $0x8] sm:$0xff] %v920_v39  ;;  %v777_v24 = vpop.permute.xlu1 %776  ;;  %v785_v52 = vpop.permute.xlu0 %784  ;;  %v2013_v55 = vld [vmem:[#allocation35_spill] sm:$0xff] }
 0x308   : > { %v923_v40 = vmul.f32 %v777_v24, %v1275_v14  ;;  %v924_v8 = vmul.f32 %v777_v24, %v1278_v15  ;;  %v927_v9 = vmul.f32 %v785_v52, %v1333_v36  ;;  %v928_v2 = vmul.f32 %v785_v52, %v1336_v37  ;;  %v2014_v24 = vld [vmem:[#allocation10_spill] sm:$0xff] }
 0x30a   : > { %995 = vst [vmem:[%s1731_s17 + $0x20] sm:$0xff] %v923_v40  ;;  %996 = vst [vmem:[%s1731_s17 + $0x28] sm:$0xff] %v924_v8  ;;  %v2015_v40 = vld [vmem:[#allocation11_spill] sm:$0xff] }
 0x30b   : > { %999 = vst [vmem:[%s1731_s17 + $0x40] sm:$0xff] %v927_v9  ;;  %1000 = vst [vmem:[%s1731_s17 + $0x48] sm:$0xff] %v928_v2  ;;  %v781_v4 = vpop.permute.xlu1 %780  ;;  %v793_v31 = vpop.permute.xlu0 %792 }
 0x30c   : > { %v925_v35 = vmul.f32 %v781_v4, %v1307_v26  ;;  %v926_v14 = vmul.f32 %v781_v4, %v1310_v27  ;;  %v931_v15 = vmul.f32 %v793_v31, %v1397_v60  ;;  %v932_v36 = vmul.f32 %v793_v31, %v1400_v61  ;;  %v2016_v4 = vld [vmem:[#allocation48_spill] sm:$0xff] }
 0x30e   : > { %997 = vst [vmem:[%s1731_s17 + $0x30] sm:$0xff] %v925_v35  ;;  %998 = vst [vmem:[%s1731_s17 + $0x38] sm:$0xff] %v926_v14  ;;  %v2017_v35 = vld [vmem:[#allocation49_spill] sm:$0xff] }
 0x30f   : > { %1003 = vst [vmem:[%s1731_s17 + $0x60] sm:$0xff] %v931_v15  ;;  %1004 = vst [vmem:[%s1731_s17 + $0x68] sm:$0xff] %v932_v36  ;;  %v789_v37 = vpop.permute.xlu1 %788  ;;  %v801_v17 = vpop.permute.xlu0 %800  ;;  %v2018_v15 = vld [vmem:[#allocation16_spill] sm:$0xff] }
 0x310   : > { %v929_v50 = vmul.f32 %v789_v37, %v1365_v48  ;;  %v930_v26 = vmul.f32 %v789_v37, %v1368_v49  ;;  %v935_v27 = vmul.f32 %v801_v17, %v1461_v3  ;;  %v936_v60 = vmul.f32 %v801_v17, %v1464_v7  ;;  %v2019_v37 = vld [vmem:[#allocation17_spill] sm:$0xff] }
 0x312   : > { %1001 = vst [vmem:[%s1731_s17 + $0x50] sm:$0xff] %v929_v50  ;;  %1002 = vst [vmem:[%s1731_s17 + $0x58] sm:$0xff] %v930_v26 }
 0x313   : > { %1007 = vst [vmem:[%s1731_s17 + $0x80] sm:$0xff] %v935_v27  ;;  %1008 = vst [vmem:[%s1731_s17 + $0x88] sm:$0xff] %v936_v60  ;;  %v797_v61 = vpop.permute.xlu1 %796  ;;  %v812_v41 = vpop.permute.xlu0 %811  ;;  %v2020_v27 = vld [vmem:[#allocation8_spill] sm:$0xff] }
 0x314   : > { %v933_v0 = vmul.f32 %v797_v61, %v1996_v22  ;;  %v934_v48 = vmul.f32 %v797_v61, %v1997_v45  ;;  %v939_v49 = vmul.f32 %v812_v41, %v1998_v57  ;;  %v940_v3 = vmul.f32 %v812_v41, %v1999_v18  ;;  %v2021_v61 = vld [vmem:[#allocation9_spill] sm:$0xff]  ;;  %v2022_v22 = vld [vmem:[#allocation26_spill] sm:$0xff]  ;;  %v2023_v45 = vld [vmem:[#allocation27_spill] sm:$0xff] }
 0x315   : > { %v2024_v18 = vld [vmem:[#allocation20_spill] sm:$0xff] }
 0x316   : > { %1005 = vst [vmem:[%s1731_s17 + $0x70] sm:$0xff] %v933_v0  ;;  %1006 = vst [vmem:[%s1731_s17 + $0x78] sm:$0xff] %v934_v48 }
 0x317   : > { %1011 = vst [vmem:[%s1731_s17 + $0xa0] sm:$0xff] %v939_v49  ;;  %1012 = vst [vmem:[%s1731_s17 + $0xa8] sm:$0xff] %v940_v3  ;;  %v808_v7 = vpop.permute.xlu1 %807  ;;  %v820_v23 = vpop.permute.xlu0 %819 }
 0x318   : > { %v937_v10 = vmul.f32 %v808_v7, %v2000_v11  ;;  %v938_v6 = vmul.f32 %v808_v7, %v2001_v21  ;;  %v943_v13 = vmul.f32 %v820_v23, %v2002_v16  ;;  %v944_v46 = vmul.f32 %v820_v23, %v2003_v53  ;;  %v2025_v7 = vld [vmem:[#allocation21_spill] sm:$0xff]  ;;  %v2026_v11 = vld [vmem:[#allocation40_spill] sm:$0xff] }
 0x319   : > { %v2027_v21 = vld [vmem:[#allocation41_spill] sm:$0xff]  ;;  %v2028_v53 = vld [vmem:[#allocation32_spill] sm:$0xff] }
 0x31a   : > { %1009 = vst [vmem:[%s1731_s17 + $0x90] sm:$0xff] %v937_v10  ;;  %1010 = vst [vmem:[%s1731_s17 + $0x98] sm:$0xff] %v938_v6 }
 0x31b   : > { %1015 = vst [vmem:[%s1731_s17 + $0xc0] sm:$0xff] %v943_v13  ;;  %1016 = vst [vmem:[%s1731_s17 + $0xc8] sm:$0xff] %v944_v46  ;;  %v816_v5 = vpop.permute.xlu1 %815  ;;  %v828_v20 = vpop.permute.xlu0 %827 }
 0x31c   : > { %v941_v29 = vmul.f32 %v816_v5, %v2004_v28  ;;  %v942_v47 = vmul.f32 %v816_v5, %v2005_v56  ;;  %v947_v58 = vmul.f32 %v828_v20, %v2006_v59  ;;  %v948_v44 = vmul.f32 %v828_v20, %v2007_v43  ;;  %v2029_v5 = vld [vmem:[#allocation33_spill] sm:$0xff]  ;;  %v2030_v28 = vld [vmem:[#allocation50_spill] sm:$0xff]  ;;  %v2031_v56 = vld [vmem:[#allocation51_spill] sm:$0xff] }
 0x31d   : > { %v2032_v43 = vld [vmem:[#allocation46_spill] sm:$0xff] }
 0x31e   : > { %1013 = vst [vmem:[%s1731_s17 + $0xb0] sm:$0xff] %v941_v29  ;;  %1014 = vst [vmem:[%s1731_s17 + $0xb8] sm:$0xff] %v942_v47 }
 0x31f   : > { %1019 = vst [vmem:[%s1731_s17 + $0xe0] sm:$0xff] %v947_v58  ;;  %1020 = vst [vmem:[%s1731_s17 + $0xe8] sm:$0xff] %v948_v44  ;;  %v824_v62 = vpop.permute.xlu1 %823  ;;  %v836_v42 = vpop.permute.xlu0 %835 }
 0x320   : > { %v945_v30 = vmul.f32 %v824_v62, %v2008_v34  ;;  %v946_v33 = vmul.f32 %v824_v62, %v2009_v12  ;;  %v951_v63 = vmul.f32 %v836_v42, %v2010_v32  ;;  %v952_v38 = vmul.f32 %v836_v42, %v2011_v54  ;;  %v2033_v62 = vld [vmem:[#allocation47_spill] sm:$0xff]  ;;  %v2034_v34 = vld [vmem:[#allocation18_spill] sm:$0xff] }
 0x321   : > { %v2035_v12 = vld [vmem:[#allocation19_spill] sm:$0xff]  ;;  %v2036_v54 = vld [vmem:[#allocation14_spill] sm:$0xff] }
 0x322   : > { %1017 = vst [vmem:[%s1731_s17 + $0xd0] sm:$0xff] %v945_v30  ;;  %1018 = vst [vmem:[%s1731_s17 + $0xd8] sm:$0xff] %v946_v33 }
 0x323   : > { %1023 = vst [vmem:[%s1731_s17 + $0x100] sm:$0xff] %v951_v63  ;;  %1024 = vst [vmem:[%s1731_s17 + $0x108] sm:$0xff] %v952_v38  ;;  %v832_v51 = vpop.permute.xlu1 %831  ;;  %v847_v19 = vpop.permute.xlu0 %846 }
 0x324   : > { %v949_v1 = vmul.f32 %v832_v51, %v2012_v25  ;;  %v950_v39 = vmul.f32 %v832_v51, %v2013_v55  ;;  %v955_v52 = vmul.f32 %v847_v19, %v2014_v24  ;;  %v956_v8 = vmul.f32 %v847_v19, %v2015_v40  ;;  %v2037_v51 = vld [vmem:[#allocation15_spill] sm:$0xff]  ;;  %v2038_v25 = vld [vmem:[#allocation30_spill] sm:$0xff]  ;;  %v2040_v40 = vld [vmem:[#allocation24_spill] sm:$0xff] }
 0x325   : > { %v2039_v55 = vld [vmem:[#allocation31_spill] sm:$0xff] }
 0x326   : > { %1021 = vst [vmem:[%s1731_s17 + $0xf0] sm:$0xff] %v949_v1  ;;  %1022 = vst [vmem:[%s1731_s17 + $0xf8] sm:$0xff] %v950_v39 }
 0x327   : > { %1027 = vst [vmem:[%s1731_s17 + $0x120] sm:$0xff] %v955_v52  ;;  %1028 = vst [vmem:[%s1731_s17 + $0x128] sm:$0xff] %v956_v8  ;;  %v840_v9 = vpop.permute.xlu1 %839  ;;  %v855_v2 = vpop.permute.xlu0 %854 }
 0x328   : > { %v953_v31 = vmul.f32 %v840_v9, %v2016_v4  ;;  %v954_v14 = vmul.f32 %v840_v9, %v2017_v35  ;;  %v959_v36 = vmul.f32 %v855_v2, %v2018_v15  ;;  %v960_v17 = vmul.f32 %v855_v2, %v2019_v37  ;;  %v2041_v9 = vld [vmem:[#allocation25_spill] sm:$0xff]  ;;  %v2042_v4 = vld [vmem:[#allocation44_spill] sm:$0xff]  ;;  %v2044_v37 = vld [vmem:[#allocation38_spill] sm:$0xff] }
 0x329   : > { %v2043_v35 = vld [vmem:[#allocation45_spill] sm:$0xff] }
 0x32a   : > { %1025 = vst [vmem:[%s1731_s17 + $0x110] sm:$0xff] %v953_v31  ;;  %1026 = vst [vmem:[%s1731_s17 + $0x118] sm:$0xff] %v954_v14 }
 0x32b   : > { %1031 = vst [vmem:[%s1731_s17 + $0x140] sm:$0xff] %v959_v36  ;;  %1032 = vst [vmem:[%s1731_s17 + $0x148] sm:$0xff] %v960_v17  ;;  %v851_v50 = vpop.permute.xlu1 %850  ;;  %v863_v26 = vpop.permute.xlu0 %862 }
 0x32c   : > { %v957_v60 = vmul.f32 %v851_v50, %v2020_v27  ;;  %v958_v41 = vmul.f32 %v851_v50, %v2021_v61  ;;  %v963_v0 = vmul.f32 %v863_v26, %v2022_v22  ;;  %v964_v48 = vmul.f32 %v863_v26, %v2023_v45  ;;  %v2045_v50 = vld [vmem:[#allocation39_spill] sm:$0xff]  ;;  %v2046_v27 = vld [vmem:[#allocation56_spill] sm:$0xff]  ;;  %v2047_v61 = vld [vmem:[#allocation57_spill] sm:$0xff] }
 0x32e   : > { %1029 = vst [vmem:[%s1731_s17 + $0x130] sm:$0xff] %v957_v60  ;;  %1030 = vst [vmem:[%s1731_s17 + $0x138] sm:$0xff] %v958_v41 }
 0x32f   : > { %1035 = vst [vmem:[%s1731_s17 + $0x160] sm:$0xff] %v963_v0  ;;  %1036 = vst [vmem:[%s1731_s17 + $0x168] sm:$0xff] %v964_v48  ;;  %v859_v57 = vpop.permute.xlu1 %858  ;;  %v871_v49 = vpop.permute.xlu0 %870  ;;  %v2048_v0 = vld [vmem:[#allocation52_spill] sm:$0xff]  ;;  %v2049_v48 = vld [vmem:[#allocation53_spill] sm:$0xff] }
 0x330   : > { %v961_v3 = vmul.f32 %v859_v57, %v2024_v18  ;;  %v962_v23 = vmul.f32 %v859_v57, %v2025_v7  ;;  %v967_v10 = vmul.f32 %v871_v49, %v2026_v11  ;;  %v968_v6 = vmul.f32 %v871_v49, %v2027_v21  ;;  %v2050_v18 = vld [vmem:[#allocation54_spill] sm:$0xff]  ;;  %v2051_v7 = vld [vmem:[#allocation55_spill] sm:$0xff] }
 0x332   : > { %1033 = vst [vmem:[%s1731_s17 + $0x150] sm:$0xff] %v961_v3  ;;  %1034 = vst [vmem:[%s1731_s17 + $0x158] sm:$0xff] %v962_v23 }
 0x333   : > { %1039 = vst [vmem:[%s1731_s17 + $0x180] sm:$0xff] %v967_v10  ;;  %1040 = vst [vmem:[%s1731_s17 + $0x188] sm:$0xff] %v968_v6  ;;  %v867_v16 = vpop.permute.xlu1 %866  ;;  %v879_v13 = vpop.permute.xlu0 %878 }
 0x334   : > { %v965_v46 = vmul.f32 %v867_v16, %v2028_v53  ;;  %v966_v20 = vmul.f32 %v867_v16, %v2029_v5  ;;  %v971_v29 = vmul.f32 %v879_v13, %v2030_v28  ;;  %v972_v47 = vmul.f32 %v879_v13, %v2031_v56 }
 0x336   : > { %1037 = vst [vmem:[%s1731_s17 + $0x170] sm:$0xff] %v965_v46  ;;  %1038 = vst [vmem:[%s1731_s17 + $0x178] sm:$0xff] %v966_v20 }
 0x337   : > { %1043 = vst [vmem:[%s1731_s17 + $0x1a0] sm:$0xff] %v971_v29  ;;  %1044 = vst [vmem:[%s1731_s17 + $0x1a8] sm:$0xff] %v972_v47  ;;  %v875_v59 = vpop.permute.xlu1 %874  ;;  %v890_v58 = vpop.permute.xlu0 %889 }
 0x338   : > { %v969_v44 = vmul.f32 %v875_v59, %v2032_v43  ;;  %v970_v42 = vmul.f32 %v875_v59, %v2033_v62  ;;  %v975_v30 = vmul.f32 %v890_v58, %v2034_v34  ;;  %v976_v33 = vmul.f32 %v890_v58, %v2035_v12 }
 0x33a   : > { %1041 = vst [vmem:[%s1731_s17 + $0x190] sm:$0xff] %v969_v44  ;;  %1042 = vst [vmem:[%s1731_s17 + $0x198] sm:$0xff] %v970_v42 }
 0x33b   : > { %1047 = vst [vmem:[%s1731_s17 + $0x1c0] sm:$0xff] %v975_v30  ;;  %1048 = vst [vmem:[%s1731_s17 + $0x1c8] sm:$0xff] %v976_v33  ;;  %v886_v32 = vpop.permute.xlu1 %885  ;;  %v898_v63 = vpop.permute.xlu0 %897 }
 0x33c   : > { %v973_v38 = vmul.f32 %v886_v32, %v2036_v54  ;;  %v974_v19 = vmul.f32 %v886_v32, %v2037_v51  ;;  %v979_v1 = vmul.f32 %v898_v63, %v2038_v25  ;;  %v980_v39 = vmul.f32 %v898_v63, %v2039_v55 }
 0x33e   : > { %1045 = vst [vmem:[%s1731_s17 + $0x1b0] sm:$0xff] %v973_v38  ;;  %1046 = vst [vmem:[%s1731_s17 + $0x1b8] sm:$0xff] %v974_v19 }
 0x33f   : > { %1051 = vst [vmem:[%s1731_s17 + $0x1e0] sm:$0xff] %v979_v1  ;;  %1052 = vst [vmem:[%s1731_s17 + $0x1e8] sm:$0xff] %v980_v39  ;;  %v894_v24 = vpop.permute.xlu1 %893  ;;  %v906_v52 = vpop.permute.xlu0 %905 }
 0x340   : > { %v977_v8 = vmul.f32 %v894_v24, %v2040_v40  ;;  %v978_v2 = vmul.f32 %v894_v24, %v2041_v9  ;;  %v983_v31 = vmul.f32 %v906_v52, %v2042_v4  ;;  %v984_v14 = vmul.f32 %v906_v52, %v2043_v35 }
 0x342   : > { %1049 = vst [vmem:[%s1731_s17 + $0x1d0] sm:$0xff] %v977_v8  ;;  %1050 = vst [vmem:[%s1731_s17 + $0x1d8] sm:$0xff] %v978_v2 }
 0x343   : > { %1055 = vst [vmem:[%s1731_s17 + $0x200] sm:$0xff] %v983_v31  ;;  %1056 = vst [vmem:[%s1731_s17 + $0x208] sm:$0xff] %v984_v14  ;;  %v902_v15 = vpop.permute.xlu1 %901  ;;  %v914_v36 = vpop.permute.xlu0 %913 }
 0x344   : > { %v981_v17 = vmul.f32 %v902_v15, %v2044_v37  ;;  %v982_v26 = vmul.f32 %v902_v15, %v2045_v50  ;;  %v987_v60 = vmul.f32 %v914_v36, %v2046_v27  ;;  %v988_v41 = vmul.f32 %v914_v36, %v2047_v61 }
 0x346   : > { %1053 = vst [vmem:[%s1731_s17 + $0x1f0] sm:$0xff] %v981_v17  ;;  %1054 = vst [vmem:[%s1731_s17 + $0x1f8] sm:$0xff] %v982_v26 }
 0x347   : > { %1059 = vst [vmem:[%s1731_s17 + $0x220] sm:$0xff] %v987_v60  ;;  %1060 = vst [vmem:[%s1731_s17 + $0x228] sm:$0xff] %v988_v41  ;;  %v910_v22 = vpop.permute.xlu1 %909 }
 0x348   : > { %v985_v45 = vmul.f32 %v910_v22, %v2048_v0  ;;  %v986_v57 = vmul.f32 %v910_v22, %v2049_v48 }
 0x34a   : > { %1057 = vst [vmem:[%s1731_s17 + $0x210] sm:$0xff] %v985_v45  ;;  %1058 = vst [vmem:[%s1731_s17 + $0x218] sm:$0xff] %v986_v57 }
 0x34b   : > { %v918_v49 = vpop.permute.xlu1 %917 }
 0x34c   : > { %v989_v3 = vmul.f32 %v918_v49, %v2050_v18  ;;  %v990_v23 = vmul.f32 %v918_v49, %v2051_v7 }
 0x34e   : > { %1061 = vst [vmem:[%s1731_s17 + $0x230] sm:$0xff] %v989_v3  ;;  %1062 = vst [vmem:[%s1731_s17 + $0x238] sm:$0xff] %v990_v23 }
 0x34f PF: > { %s13_s12 = sadd.s32 1, %s1194_s12  }
 0x350   : > { %p10_p4 = scmp.ge.s32.totalorder %s13_s12, 4  }
 0x352   :  { %12 = sbr.rel (!%p10_p4) target bundleno = 1 (0x1), region = 62 }

</bundles_post_ra>
